<compile_context>
chip_gen: v7x
topology: tpu7x:2x2x1
jax: 0.10.0
libtpu: 0.0.40
codegen_flags: <defaults>
</compile_context>

<pallas_src>
import functools

import jax
import jax.numpy as jnp
from jax.experimental import pallas as pl
from jax.experimental.pallas import tpu as pltpu

_MiB = 1024 * 1024


def _vmem_budget_bytes():
    """Generation-aware scoped-VMEM budget (~half of physical capacity)."""
    cap = None
    try:
        cap = int(pltpu.get_tpu_info().vmem_capacity_bytes)
    except Exception:
        cap = None
    if not cap:
        try:
            kind = jax.devices()[0].device_kind.lower()
            cap = 64 * _MiB if "v7" in kind else 128 * _MiB
        except Exception:
            cap = 64 * _MiB  # conservative default (v7x-safe)
    return max(32 * _MiB, min(cap // 2, 96 * _MiB))


def _pick_tile(size, align, target):
    """Fixed aligned tile: the full dim when it already fits `target` (a block
    dim equal to the full array dim is always legal), otherwise the largest
    multiple of `align` <= target.  Edge blocks come from a cdiv grid and are
    masked by Pallas, so the tile never has to divide `size`."""
    if size <= target:
        return size
    return max(align, target - (target % align))


# ----------------------------- per-tile kernels ------------------------------

def _copy_kernel(x_ref, o_ref):
    # Leading-axis swap: pure data movement; the swap lives in the out_spec
    # index_map, the kernel is a lane-dense copy.
    o_ref[...] = x_ref[...]


def _t2d_kernel(x_ref, o_ref):
    # Swap of the last two dims: single minor-dims XLU transpose per block.
    o_ref[...] = x_ref[...].T


def _c2a_block_kernel(x_ref, o_ref):
    # Leading dim <-> lane dim.  Block: (ta, th, tw) -> (tw, th, ta) as one
    # whole-block relayout (preferred: no per-row strided slices).
    o_ref[...] = jnp.swapaxes(x_ref[...], 0, 2)


def _c2a_loop_kernel(th, x_ref, o_ref):
    # Fallback if the 3-D transpose can't be lowered: bounded unroll (th<=8/16)
    # of minor 2-D transposes.  Middle-axis slices are strided but bounded.
    for m in range(th):
        o_ref[:, m, :] = x_ref[:, m, :].T


def _c2b_block_kernel(x_ref, o_ref):
    # Leading dim <-> sublane dim (lane untouched).  (ta, th, tw)->(th, ta, tw)
    # as one whole-block relayout.
    o_ref[...] = jnp.swapaxes(x_ref[...], 0, 1)


def _c2b_loop_kernel(th, x_ref, o_ref):
    # Fallback: iterate the OUTPUT's leading axis so every store is a dense
    # leading-axis slab (strided loads only); bounded unroll (th<=8/16).
    for m in range(th):
        o_ref[m, :, :] = x_ref[:, m, :]


# --------------------------------- wrapper -----------------------------------

def trans_pallas(x, dim1, dim2):
    """Equivalent of torch.Tensor.transpose(dim1, dim2) as a Pallas TPU kernel."""
    n = x.ndim
    dim1 %= n
    dim2 %= n
    if dim1 == dim2:
        return x
    if dim1 > dim2:
        dim1, dim2 = dim2, dim1

    perm = list(range(n))
    perm[dim1], perm[dim2] = perm[dim2], perm[dim1]
    shape = x.shape
    out_shape = tuple(shape[p] for p in perm)
    H, W = shape[n - 2], shape[n - 1]
    itemsize = x.dtype.itemsize
    pack = max(1, 4 // itemsize)      # elements per 32-bit word
    sub = 8 * pack                    # dtype-aware sublane tile unit

    budget = _vmem_budget_bytes()
    big = budget >= 64 * _MiB         # v5e/v6e; v7x stays conservative

    tile = [1] * n
    squeeze = [True] * n
    squeeze[n - 2] = squeeze[n - 1] = False

    if dim2 < n - 2:
        # Case B: both swapped dims are leading -> copy kernel, swap expressed
        # entirely in the out_spec index_map.
        tile[n - 2] = _pick_tile(H, sub, 512 if big else 256)
        tile[n - 1] = _pick_tile(W, 128, 1024 if big else 512)
        # Fold untouched leading dims into the block (innermost first) so small
        # trailing dims still produce large, lane-dense blocks.
        fold_limit = (2 if big else 1) * _MiB
        blk_bytes = tile[n - 2] * tile[n - 1] * itemsize
        for i in range(n - 3, -1, -1):
            if i in (dim1, dim2):
                continue
            if blk_bytes * shape[i] <= fold_limit:
                tile[i] = shape[i]
                squeeze[i] = False
                blk_bytes *= shape[i]
        kernels = (_copy_kernel,)
    elif dim1 == n - 2:
        # Case C1: swap of the last two dims -> per-block 2-D XLU transpose.
        t = 512 if big else 256
        tile[n - 2] = _pick_tile(H, 128, t)
        tile[n - 1] = _pick_tile(W, 128, t)
        kernels = (_t2d_kernel,)
    elif dim2 == n - 1:
        # Case C2a: leading dim <-> lane dim.
        squeeze[dim1] = False
        tile[dim1] = _pick_tile(shape[dim1], 128, 512 if big else 256)
        tile[n - 2] = _pick_tile(H, sub, sub)           # small untouched sublane slab
        tile[n - 1] = _pick_tile(W, 128, 256)
        kernels = (_c2a_block_kernel,
                   functools.partial(_c2a_loop_kernel, tile[n - 2]))
    else:
        # Case C2b: leading dim <-> sublane dim (lane axis untouched).
        squeeze[dim1] = False
        tile[dim1] = _pick_tile(shape[dim1], sub, 256 if big else 128)
        tile[n - 2] = _pick_tile(H, sub, sub)
        tile[n - 1] = _pick_tile(W, 128, 512)
        kernels = (_c2b_block_kernel,
                   functools.partial(_c2b_loop_kernel, tile[n - 2]))

    in_block = tuple(pl.Squeezed() if squeeze[i] else tile[i] for i in range(n))
    # Output block = input block permuted by the axis swap.
    out_block = tuple(in_block[p] for p in perm)
    grid = tuple(pl.cdiv(shape[i], tile[i]) for i in range(n))

    in_map = lambda *idx: idx
    out_map = lambda *idx: tuple(idx[p] for p in perm)

    cost = pl.CostEstimate(
        flops=0,
        transcendentals=0,
        bytes_accessed=2 * x.size * itemsize,
    )

    last_err = None
    for kern in kernels:
        call = pl.pallas_call(
            kern,
            out_shape=jax.ShapeDtypeStruct(out_shape, x.dtype),
            grid_spec=pltpu.PrefetchScalarGridSpec(
                num_scalar_prefetch=0,
                grid=grid,
                in_specs=[pl.BlockSpec(in_block, in_map)],
                out_specs=pl.BlockSpec(out_block, out_map),
            ),
            compiler_params=pltpu.CompilerParams(
                # All blocks are independent writes; heavy H/W axes carry the
                # megacore split on multi-TC parts.
                dimension_semantics=("parallel",) * n,
                vmem_limit_bytes=budget,
            ),
            cost_estimate=cost,
        )
        try:
            return call(x)
        except Exception as e:
            # Whole-block 3-D relayout not supported by this Mosaic version:
            # retry with the bounded dense-store loop kernel.
            last_err = e
    raise last_err


if __name__ == "__main__":
    key = jax.random.PRNGKey(0)
    # Small NCHW-like input, matching a typical use of trans(dim1=1, dim2=2).
    x = jax.random.normal(key, (2, 4, 16, 16), dtype=jnp.float32)

    # Primary case implied by the module: swap channel and height axes.
    out = jax.block_until_ready(trans_pallas(x, 1, 2))
    ref = jnp.swapaxes(x, 1, 2)
    assert out.shape == ref.shape, (out.shape, ref.shape)
    assert jnp.array_equal(out, ref), "mismatch vs reference transpose (1,2)"

    # Exercise every code path (leading-leading, last-two, leading-lane).
    for d1, d2 in [(0, 1), (2, 3), (0, 3), (1, 3)]:
        o = jax.block_until_ready(trans_pallas(x, d1, d2))
        assert jnp.array_equal(o, jnp.swapaxes(x, d1, d2)), (d1, d2)

    print("KERNEL_OK")
</pallas_src>

<mosaic_0001>
module attributes {stable_mosaic.version = 11 : i64} {
  func.func @_c2b_block_kernel(%arg0: i32, %arg1: i32, %arg2: i32, %arg3: i32, %arg4: memref<1x4x8x16xf32, #tpu.memory_space<vmem>>, %arg5: memref<1x8x4x16xf32, #tpu.memory_space<vmem>>) attributes {dimension_semantics = [#tpu.dimension_semantics<parallel>, #tpu.dimension_semantics<parallel>, #tpu.dimension_semantics<parallel>, #tpu.dimension_semantics<parallel>], iteration_bounds = array<i64: 2, 1, 2, 1>, scalar_prefetch = 0 : i64, scratch_operands = 0 : i64, tpu.core_type = #tpu.core_type<tc>, window_params = [{transform_indices = @transform_0, window_bounds = array<i64: 1, 4, 8, 16>}, {transform_indices = @transform_1, window_bounds = array<i64: 1, 8, 4, 16>}]} {
    %c0 = arith.constant 0 : index
    %c0_0 = arith.constant 0 : index
    %c0_1 = arith.constant 0 : index
    %c0_2 = arith.constant 0 : index
    %0 = vector.load %arg4[%c0, %c0_0, %c0_1, %c0_2] : memref<1x4x8x16xf32, #tpu.memory_space<vmem>>, vector<1x4x8x16xf32>
    %1 = vector.shape_cast %0 : vector<1x4x8x16xf32> to vector<4x8x16xf32>
    %2 = tpu.transpose %1, [1, 0, 2] : vector<4x8x16xf32> -> vector<8x4x16xf32>
    %c0_3 = arith.constant 0 : index
    %c0_4 = arith.constant 0 : index
    %c0_5 = arith.constant 0 : index
    %c0_6 = arith.constant 0 : index
    %3 = vector.load %arg5[%c0_3, %c0_4, %c0_5, %c0_6] : memref<1x8x4x16xf32, #tpu.memory_space<vmem>>, vector<1x8x4x16xf32>
    %4 = vector.shape_cast %3 : vector<1x8x4x16xf32> to vector<8x4x16xf32>
    %5 = vector.shape_cast %2 : vector<8x4x16xf32> to vector<1x8x4x16xf32>
    tpu.vector_store %arg5[%c0_3, %c0_4, %c0_5, %c0_6], %5 {strides = array<i32>} : memref<1x8x4x16xf32, #tpu.memory_space<vmem>>, vector<1x8x4x16xf32>,
    return
  }
  func.func @transform_0(%arg0: i32, %arg1: i32, %arg2: i32, %arg3: i32) -> (i32, i32, i32, i32) {
    %c0_i32 = arith.constant 0 : i32
    return %arg0, %arg1, %arg2, %arg3 : i32, i32, i32, i32
  }
  func.func @transform_1(%arg0: i32, %arg1: i32, %arg2: i32, %arg3: i32) -> (i32, i32, i32, i32) {
    %c0_i32 = arith.constant 0 : i32
    return %arg0, %arg2, %arg1, %arg3 : i32, i32, i32, i32
  }
}

module attributes {stable_mosaic.version = 11 : i64} {
  func.func @_c2b_loop_kernel(%arg0: i32, %arg1: i32, %arg2: i32, %arg3: i32, %arg4: memref<1x4x8x16xf32, #tpu.memory_space<vmem>>, %arg5: memref<1x8x4x16xf32, #tpu.memory_space<vmem>>) attributes {dimension_semantics = [#tpu.dimension_semantics<parallel>, #tpu.dimension_semantics<parallel>, #tpu.dimension_semantics<parallel>, #tpu.dimension_semantics<parallel>], iteration_bounds = array<i64: 2, 1, 2, 1>, scalar_prefetch = 0 : i64, scratch_operands = 0 : i64, tpu.core_type = #tpu.core_type<tc>, window_params = [{transform_indices = @transform_0, window_bounds = array<i64: 1, 4, 8, 16>}, {transform_indices = @transform_1, window_bounds = array<i64: 1, 8, 4, 16>}]} {
    %c0 = arith.constant 0 : index
    %c0_0 = arith.constant 0 : index
    %c0_1 = arith.constant 0 : index
    %c0_2 = arith.constant 0 : index
    %0 = vector.load %arg4[%c0, %c0_0, %c0_1, %c0_2] : memref<1x4x8x16xf32, #tpu.memory_space<vmem>>, vector<1x4x1x16xf32>
    %1 = vector.shape_cast %0 : vector<1x4x1x16xf32> to vector<4x16xf32>
    %c0_3 = arith.constant 0 : index
    %c0_4 = arith.constant 0 : index
    %c0_5 = arith.constant 0 : index
    %c0_6 = arith.constant 0 : index
    %2 = vector.load %arg5[%c0_3, %c0_4, %c0_5, %c0_6] : memref<1x8x4x16xf32, #tpu.memory_space<vmem>>, vector<1x1x4x16xf32>
    %3 = vector.shape_cast %2 : vector<1x1x4x16xf32> to vector<4x16xf32>
    %4 = vector.shape_cast %1 : vector<4x16xf32> to vector<1x1x4x16xf32>
    tpu.vector_store %arg5[%c0_3, %c0_4, %c0_5, %c0_6], %4 {strides = array<i32>} : memref<1x8x4x16xf32, #tpu.memory_space<vmem>>, vector<1x1x4x16xf32>,
    %c0_7 = arith.constant 0 : index
    %c0_8 = arith.constant 0 : index
    %c1 = arith.constant 1 : index
    %c0_9 = arith.constant 0 : index
    %5 = vector.load %arg4[%c0_7, %c0_8, %c1, %c0_9] : memref<1x4x8x16xf32, #tpu.memory_space<vmem>>, vector<1x4x1x16xf32>
    %6 = vector.shape_cast %5 : vector<1x4x1x16xf32> to vector<4x16xf32>
    %c0_10 = arith.constant 0 : index
    %c1_11 = arith.constant 1 : index
    %c0_12 = arith.constant 0 : index
    %c0_13 = arith.constant 0 : index
    %7 = vector.load %arg5[%c0_10, %c1_11, %c0_12, %c0_13] : memref<1x8x4x16xf32, #tpu.memory_space<vmem>>, vector<1x1x4x16xf32>
    %8 = vector.shape_cast %7 : vector<1x1x4x16xf32> to vector<4x16xf32>
    %9 = vector.shape_cast %6 : vector<4x16xf32> to vector<1x1x4x16xf32>
    tpu.vector_store %arg5[%c0_10, %c1_11, %c0_12, %c0_13], %9 {strides = array<i32>} : memref<1x8x4x16xf32, #tpu.memory_space<vmem>>, vector<1x1x4x16xf32>,
    %c0_14 = arith.constant 0 : index
    %c0_15 = arith.constant 0 : index
    %c2 = arith.constant 2 : index
    %c0_16 = arith.constant 0 : index
    %10 = vector.load %arg4[%c0_14, %c0_15, %c2, %c0_16] : memref<1x4x8x16xf32, #tpu.memory_space<vmem>>, vector<1x4x1x16xf32>
    %11 = vector.shape_cast %10 : vector<1x4x1x16xf32> to vector<4x16xf32>
    %c0_17 = arith.constant 0 : index
    %c2_18 = arith.constant 2 : index
    %c0_19 = arith.constant 0 : index
    %c0_20 = arith.constant 0 : index
    %12 = vector.load %arg5[%c0_17, %c2_18, %c0_19, %c0_20] : memref<1x8x4x16xf32, #tpu.memory_space<vmem>>, vector<1x1x4x16xf32>
    %13 = vector.shape_cast %12 : vector<1x1x4x16xf32> to vector<4x16xf32>
    %14 = vector.shape_cast %11 : vector<4x16xf32> to vector<1x1x4x16xf32>
    tpu.vector_store %arg5[%c0_17, %c2_18, %c0_19, %c0_20], %14 {strides = array<i32>} : memref<1x8x4x16xf32, #tpu.memory_space<vmem>>, vector<1x1x4x16xf32>,
    %c0_21 = arith.constant 0 : index
    %c0_22 = arith.constant 0 : index
    %c3 = arith.constant 3 : index
    %c0_23 = arith.constant 0 : index
    %15 = vector.load %arg4[%c0_21, %c0_22, %c3, %c0_23] : memref<1x4x8x16xf32, #tpu.memory_space<vmem>>, vector<1x4x1x16xf32>
    %16 = vector.shape_cast %15 : vector<1x4x1x16xf32> to vector<4x16xf32>
    %c0_24 = arith.constant 0 : index
    %c3_25 = arith.constant 3 : index
    %c0_26 = arith.constant 0 : index
    %c0_27 = arith.constant 0 : index
    %17 = vector.load %arg5[%c0_24, %c3_25, %c0_26, %c0_27] : memref<1x8x4x16xf32, #tpu.memory_space<vmem>>, vector<1x1x4x16xf32>
    %18 = vector.shape_cast %17 : vector<1x1x4x16xf32> to vector<4x16xf32>
    %19 = vector.shape_cast %16 : vector<4x16xf32> to vector<1x1x4x16xf32>
    tpu.vector_store %arg5[%c0_24, %c3_25, %c0_26, %c0_27], %19 {strides = array<i32>} : memref<1x8x4x16xf32, #tpu.memory_space<vmem>>, vector<1x1x4x16xf32>,
    %c0_28 = arith.constant 0 : index
    %c0_29 = arith.constant 0 : index
    %c4 = arith.constant 4 : index
    %c0_30 = arith.constant 0 : index
    %20 = vector.load %arg4[%c0_28, %c0_29, %c4, %c0_30] : memref<1x4x8x16xf32, #tpu.memory_space<vmem>>, vector<1x4x1x16xf32>
    %21 = vector.shape_cast %20 : vector<1x4x1x16xf32> to vector<4x16xf32>
    %c0_31 = arith.constant 0 : index
    %c4_32 = arith.constant 4 : index
    %c0_33 = arith.constant 0 : index
    %c0_34 = arith.constant 0 : index
    %22 = vector.load %arg5[%c0_31, %c4_32, %c0_33, %c0_34] : memref<1x8x4x16xf32, #tpu.memory_space<vmem>>, vector<1x1x4x16xf32>
    %23 = vector.shape_cast %22 : vector<1x1x4x16xf32> to vector<4x16xf32>
    %24 = vector.shape_cast %21 : vector<4x16xf32> to vector<1x1x4x16xf32>
    tpu.vector_store %arg5[%c0_31, %c4_32, %c0_33, %c0_34], %24 {strides = array<i32>} : memref<1x8x4x16xf32, #tpu.memory_space<vmem>>, vector<1x1x4x16xf32>,
    %c0_35 = arith.constant 0 : index
    %c0_36 = arith.constant 0 : index
    %c5 = arith.constant 5 : index
    %c0_37 = arith.constant 0 : index
    %25 = vector.load %arg4[%c0_35, %c0_36, %c5, %c0_37] : memref<1x4x8x16xf32, #tpu.memory_space<vmem>>, vector<1x4x1x16xf32>
    %26 = vector.shape_cast %25 : vector<1x4x1x16xf32> to vector<4x16xf32>
    %c0_38 = arith.constant 0 : index
    %c5_39 = arith.constant 5 : index
    %c0_40 = arith.constant 0 : index
    %c0_41 = arith.constant 0 : index
    %27 = vector.load %arg5[%c0_38, %c5_39, %c0_40, %c0_41] : memref<1x8x4x16xf32, #tpu.memory_space<vmem>>, vector<1x1x4x16xf32>
    %28 = vector.shape_cast %27 : vector<1x1x4x16xf32> to vector<4x16xf32>
    %29 = vector.shape_cast %26 : vector<4x16xf32> to vector<1x1x4x16xf32>
    tpu.vector_store %arg5[%c0_38, %c5_39, %c0_40, %c0_41], %29 {strides = array<i32>} : memref<1x8x4x16xf32, #tpu.memory_space<vmem>>, vector<1x1x4x16xf32>,
    %c0_42 = arith.constant 0 : index
    %c0_43 = arith.constant 0 : index
    %c6 = arith.constant 6 : index
    %c0_44 = arith.constant 0 : index
    %30 = vector.load %arg4[%c0_42, %c0_43, %c6, %c0_44] : memref<1x4x8x16xf32, #tpu.memory_space<vmem>>, vector<1x4x1x16xf32>
    %31 = vector.shape_cast %30 : vector<1x4x1x16xf32> to vector<4x16xf32>
    %c0_45 = arith.constant 0 : index
    %c6_46 = arith.constant 6 : index
    %c0_47 = arith.constant 0 : index
    %c0_48 = arith.constant 0 : index
    %32 = vector.load %arg5[%c0_45, %c6_46, %c0_47, %c0_48] : memref<1x8x4x16xf32, #tpu.memory_space<vmem>>, vector<1x1x4x16xf32>
    %33 = vector.shape_cast %32 : vector<1x1x4x16xf32> to vector<4x16xf32>
    %34 = vector.shape_cast %31 : vector<4x16xf32> to vector<1x1x4x16xf32>
    tpu.vector_store %arg5[%c0_45, %c6_46, %c0_47, %c0_48], %34 {strides = array<i32>} : memref<1x8x4x16xf32, #tpu.memory_space<vmem>>, vector<1x1x4x16xf32>,
    %c0_49 = arith.constant 0 : index
    %c0_50 = arith.constant 0 : index
    %c7 = arith.constant 7 : index
    %c0_51 = arith.constant 0 : index
    %35 = vector.load %arg4[%c0_49, %c0_50, %c7, %c0_51] : memref<1x4x8x16xf32, #tpu.memory_space<vmem>>, vector<1x4x1x16xf32>
    %36 = vector.shape_cast %35 : vector<1x4x1x16xf32> to vector<4x16xf32>
    %c0_52 = arith.constant 0 : index
    %c7_53 = arith.constant 7 : index
    %c0_54 = arith.constant 0 : index
    %c0_55 = arith.constant 0 : index
    %37 = vector.load %arg5[%c0_52, %c7_53, %c0_54, %c0_55] : memref<1x8x4x16xf32, #tpu.memory_space<vmem>>, vector<1x1x4x16xf32>
    %38 = vector.shape_cast %37 : vector<1x1x4x16xf32> to vector<4x16xf32>
    %39 = vector.shape_cast %36 : vector<4x16xf32> to vector<1x1x4x16xf32>
    tpu.vector_store %arg5[%c0_52, %c7_53, %c0_54, %c0_55], %39 {strides = array<i32>} : memref<1x8x4x16xf32, #tpu.memory_space<vmem>>, vector<1x1x4x16xf32>,
    return
  }
  func.func @transform_0(%arg0: i32, %arg1: i32, %arg2: i32, %arg3: i32) -> (i32, i32, i32, i32) {
    %c0_i32 = arith.constant 0 : i32
    return %arg0, %arg1, %arg2, %arg3 : i32, i32, i32, i32
  }
  func.func @transform_1(%arg0: i32, %arg1: i32, %arg2: i32, %arg3: i32) -> (i32, i32, i32, i32) {
    %c0_i32 = arith.constant 0 : i32
    return %arg0, %arg2, %arg1, %arg3 : i32, i32, i32, i32
  }
}

</mosaic_0001>

<bundles_post_ra>
// kernel: tpu_custom_call.1
= control target key start
LH: loop header
LB: loop body
LE: loop exit
PB: predicated region body
PF: predicated region fallthrough
CT: control target
= control target key end

     0   :  { %6 = vsyncpa [#allocation3], 0  ;;  %s842_s0 = inlined_call_operand.hbm [shape: f32[2,4,16,16], index: 0, kind: input, shape index: {}]   ;;  %s843_s1 = inlined_call_operand.hbm [shape: f32[2,16,4,16], index: 1, kind: output, shape index: {}]  }
   0x1   :  { %8 = vsyncpa [#allocation3 + $0x1], 0 }
   0x2   :  { %9 = vsyncpa [#allocation4], 0 }
   0x3   :  { %11 = vsyncpa [#allocation4 + $0x1], 0  ;;  %s635_s6 = smov 0   ;;  %s637_s7 = smov 0  }
   0x4   :  { %s639_s8 = smov 0   ;;  %s641_s9 = smov 0  }
   0x5   :  { %s643_s10 = smov 0   ;;  %s645_s11 = smov 0  }
   0x6   :  { %s647_s12 = smov 0   ;;  %s649_s13 = smov 0  }
   0x7 LB: > { %s379_s14 = sadd.s32 4294967295, %s613_s13   ;;  %s380_s15 = sadd.s32 4294967294, %s613_s13   ;;  %s613_s13 = sphi %s649_s13, %s17_s13   ;;  %s609_s12 = sphi %s647_s12, %s858_s12   ;;  %s605_s11 = sphi %s645_s11, %s857_s11   ;;  %s601_s10 = sphi %s643_s10, %s856_s10   ;;  %s597_s9 = sphi %s641_s9, %s855_s9   ;;  %s593_s8 = sphi %s639_s8, %s854_s8   ;;  %s589_s7 = sphi %s637_s7, %s853_s7   ;;  %s585_s6 = sphi %s635_s6, %s852_s6  }
   0x8   : > { %s35_s16 = sadd.s32 1, %s605_s11  ;;  %s43_s17 = sadd.s32 1, %s609_s12 }
   0x9   : > { %p37_p0 = scmp.ge.s32.totalorder %s35_s16, 2  ;;  %s56_s18 = sadd.s32 1, %s593_s8 }
   0xa   : > { %p63_p1 = scmp.ne.s32.totalorder %s593_s8, %s589_s7  ;;  %p64_p2 = scmp.eq.s32.totalorder %s613_s13, 0 }
   0xb   : > { %s860_s16 = smov (%p37_p0, %s35_s16), 0  ;;  %s862_s17 = smov (!%p37_p0, %s43_s17), %s609_s12 }
   0xc   : > { %s50_s19 = ssub.s32 %s605_s11, %s860_s16  ;;  %p688_p3 = por %p64_p2, %p63_p1 }
   0xd   : > { %p45_p4 = scmp.ge.s32.totalorder %s862_s17, 2  ;;  %p69_p5 = scmp.ne.s32.totalorder %s589_s7, %s585_s6 }
   0xe   : > { %p70_p6 = scmp.eq.s32.totalorder %s379_s14, 0  ;;  %p99_p7 = scmp.eq.s32.totalorder %s379_s14, 3 }
   0xf   : > { %s864_s17 = smov (%p45_p4, %s862_s17), 0  ;;  %p105_p10 = scmp.eq.s32.totalorder %s380_s15, 3 }
  0x10   : > { %p696_p8 = por %p70_p6, %p69_p5  ;;  %p700_p9 = por %p99_p7, %p63_p1 }
  0x11   : > { %s47_s23 = ssub.s32 %s609_s12, %s864_s17  ;;  %p706_p12 = por %p105_p10, %p69_p5 }
  0x12   : > { %s847_s22 = scalar_select %p700_p9, 1, 0 }
  0x13   : > { %s51_s24 = sor.u32 %s50_s19, %s47_s23  ;;  %p407_p13 = scmp.lt.s32.totalorder %s613_s13, 4 }
  0x14   : > { %p54_p11 = scmp.eq.s32.totalorder %s51_s24, 0  ;;  %s125_s26 = sand.u32 1, %s593_s8  }
  0x15   : > { %s848_s25 = scalar_select %p706_p12, 1, 0 }
  0x16   : > { %s713_s27 = scalar_select %p54_p11, %s593_s8, %s56_s18  }
  0x17   : > { %s383_s28 = sshll.u32 %s125_s26, 5  ;;  %s384_s29 = sshll.u32 %s609_s12, 3 }
  0x18   : > { %s138_s30 = sadd.s32 %s605_s11, %s384_s29  ;;  %s129_s2 = scalar_lea.vmem [#allocation2], %s383_s28 }
  0x19   : > { %s141_s3 = sshll.u32 %s129_s2, 4  ;;  %s385_s4 = sshll.u32 %s138_s30, 7  ;;  %s717_s3 = int_to_ptr.vmem [resolvable:$true] %s141_s3 }
  0x1a   : > { %s722_s15 = scalar_lea.hbm %s842_s0, %s385_s4  ;;  %p726_p0 = pnand %p407_p13, %p688_p3 }
  0x1b   : > { %s730_s19 = scalar_lea.sflag [#allocation3], %s125_s26  ;;  %s485_s23 = scalar_lea.hbm %s722_s15, 512 }
  0x1c   : > { %p486_p1 = scmp.ne.s32.totalorder %s722_s15, %s485_s23  ;;  %p487_p2 = pneg %p726_p0 }
  0x1d   : > { %s490_s28 = scalar_lea.hbm %s842_s0, 2048  ;;  %p491_p3 = scmp.lt.u32.totalorder %s722_s15, %s842_s0 }
  0x1e   : > { %p488_p4 = pnand %p487_p2, %p486_p1  ;;  %p492_p6 = scmp.lt.u32.totalorder %s490_s28, %s485_s23 }
  0x1f   : > { %p494_p10 = scmp.lt.u32.totalorder %s485_s23, %s722_s15 }
  0x20   : > { %p489_p5 = pneg %p488_p4  ;;  %p493_p7 = por %p492_p6, %p491_p3 }
  0x22   : > { %p495_p11 = por %p494_p10, %p493_p7 }
  0x24   : > { %p496_p13 = pnand %p495_p11, %p489_p5 }
  0x26   : > { %499 = shalt.err (!%p496_p13)
}
  0x27   : > { %s500_s26 = scalar_lea.vmem %s717_s3, 512  ;;  %s615_s2 = smov [#allocation2]  }
  0x28   : > { %p501_p1 = scmp.ne.s32.totalorder %s717_s3, %s500_s26  ;;  %s505_s4 = sshll.u32 %s615_s2, 4  ;;  %s506_s4 = int_to_ptr.vmem [resolvable:$false] %s505_s4 }
  0x29   : > { %s507_s5 = scalar_lea.vmem %s506_s4, 1024  ;;  %p508_p9 = scmp.lt.s32.totalorder %s717_s3, %s506_s4 }
  0x2a   : > { %p503_p4 = pnand %p501_p1, %p487_p2  ;;  %p509_p3 = scmp.lt.s32.totalorder %s507_s5, %s500_s26 }
  0x2c   : > { %p504_p12 = pneg %p503_p4  ;;  %p510_p6 = por %p509_p3, %p508_p9 }
  0x2e   : > { %p511_p7 = pnand %p510_p6, %p504_p12 }
  0x30   : > { %514 = shalt.err (!%p511_p7)
}
  0x31   : > { %s616_s14 = smov 256   ;;  %s617_s23 = smov 128  }
  0x32   : > { %s618_s20 = smov 8   ;;  %p386_p2 = scmp.ge.s32.totalorder %s613_s13, 1 }
  0x33   : > { %402 = dma.hbm_to_vmem [thread:$0]  (!%p726_p0), %s722_s15, 512, %s717_s3, %s730_s19, %s616_s14, %s617_s23, %s618_s20  }
  0x34   : > { %p149_p5 = scmp.lt.s32.totalorder %s613_s13, 5 }
  0x36   : > { %p150_p10 = pnand %p386_p2, %p149_p5 }
  0x37   : > { %s761_s24 = sand.u32 (!%p150_p10), 1, %s589_s7  }
  0x38   : > { %153 = sbr.rel (%p150_p10) target bundleno = 95 (0x5f), region = 24  ;;  %s387_s28 = sshll.u32 (!%p150_p10), %s761_s24, 5 }
  0x39   : > { %s156_s29 = scalar_lea.sflag (!%p150_p10), [#allocation3], %s761_s24  ;;  %s159_s30 = scalar_lea.vmem (!%p150_p10), [#allocation2], %s387_s28 }
  0x3f   : > { %576 = dma.done.wait (%p696_p8), %s156_s29, 512  }
  0x40   : > { %578 = vsyncadd (%p696_p8), %s156_s29, 4294966784  ;;  %v189_v0 = vlaneseq  ;;  %v619_v1 = vmov 1983009808   ;;  %v620_v4 = vmov 1934713408   ;;  %v180_v9 = vld [vmem:[%s159_s30] sm:$0xff] }
  0x41   : > { %v187_v2 = vunpack.c.l.s4 %v619_v1  ;;  %v219_v5 = vunpack.c.l.s4 %v620_v4  ;;  %v181_v10 = vld [vmem:[%s159_s30 + $0x8] sm:$0xff]  ;;  %v182_v11 = vld [vmem:[%s159_s30 + $0x10] sm:$0xff]  ;;  %s390_s3 = sshll.u32 %s597_s9, 3  ;;  %v183_v12 = vld [vmem:[%s159_s30 + $0x18] sm:$0xff]  ;;  %s391_s21 = sshll.u32 %s601_s10, 4  ;;  %vm252_vm0 = vcmask 125952  }
  0x42   : > { %v190_v3 = vshrl.u32 %v189_v0, 7  ;;  %v481_v13 = vld [vmem:[%s159_s30] ss:$16 sps:$4 sm:$0xff]   ;;  %v483_v14 = vld [vmem:[%s159_s30 + $0x8] ss:$16 sps:$4 sm:$0xff]   ;;  %v185_v15 = vcombine.high %v180_v9, %v182_v11  ;;  %v201_v16 = vcombine.high %v181_v10, %v183_v12  ;;  %s276_s15 = sadd.s32 %s391_s21, %s390_s3  ;;  %s177_s18 = scalar_lea.vmem [#allocation5], %s387_s28 }
  0x43   : > { %v188_v6 = vunpack.c.0.s8 %v187_v2  ;;  %v220_v8 = vunpack.c.0.s8 %v219_v5  ;;  %s279_s19 = sshll.u32 %s177_s18, 4  ;;  %s392_s9 = sshll.u32 %s276_s15, 6  ;;  %v621_v30 = vmov 0.0   ;;  %s776_s19 = int_to_ptr.vmem [resolvable:$true] %s279_s19 }
  0x44   : > { %s784_s2 = scalar_lea.hbm %s843_s1, %s392_s9  ;;  %s262_s4 = scalar_lea.sflag [#allocation4], %s761_s24 }
  0x45   : > { %v191_v7 = vsub.s32 %v188_v6, %v190_v3  ;;  %v223_v19 = vsub.s32 %v220_v8, %v190_v3  ;;  %s515_s5 = scalar_lea.vmem %s776_s19, 512  ;;  %p850_p9 = scmp.ne.s32.totalorder %s847_s22, 0 }
  0x46   : > { %p516_p8 = scmp.ne.s32.totalorder %s776_s19, %s515_s5  ;;  %s622_s14 = smov [#allocation5]  }
  0x47   : > { %v192_v17 = vrot.slane %v481_v13, %v191_v7  ;;  %v208_v18 = vrot.slane %v483_v14, %v191_v7  ;;  %v199_v20 = vrot.slane %v185_v15, %v191_v7  ;;  %v215_v21 = vrot.slane %v201_v16, %v191_v7  ;;  %s519_s23 = sshll.u32 %s622_s14, 4  ;;  %s520_s23 = int_to_ptr.vmem [resolvable:$false] %s519_s23 }
  0x48   : > { %p517_p12 = pnand %p516_p8, %p850_p9  ;;  %s521_s20 = scalar_lea.vmem %s520_s23, 1024 }
  0x49   : > { %v216_v22 = vcombine.low %v192_v17, %v208_v18  ;;  %v217_v23 = vcombine.high %v192_v17, %v208_v18  ;;  %v232_v24 = vcombine.low %v199_v20, %v215_v21  ;;  %v233_v25 = vcombine.high %v199_v20, %v215_v21  ;;  %p522_p11 = scmp.lt.s32.totalorder %s776_s19, %s520_s23  ;;  %p523_p13 = scmp.lt.s32.totalorder %s521_s20, %s515_s5 }
  0x4a   : > { %p518_p0 = pneg %p517_p12 }
  0x4b   : > { %v224_v26 = vrot.slane %v216_v22, %v223_v19  ;;  %v231_v27 = vrot.slane %v217_v23, %v223_v19  ;;  %v240_v28 = vrot.slane %v232_v24, %v223_v19  ;;  %v247_v29 = vrot.slane %v233_v25, %v223_v19  ;;  %p524_p1 = por %p523_p13, %p522_p11 }
  0x4d   : > { %253 = vst.msk [vmem:[%s177_s18] sm:$0xf] %vm252_vm0, %v224_v26  ;;  %v248_v31 = vcombine.high %v224_v26, %v621_v30  ;;  %255 = vst.msk [vmem:[%s177_s18 + $0x8] sm:$0xf] %vm252_vm0, %v231_v27  ;;  %v249_v32 = vcombine.high %v231_v27, %v621_v30  ;;  %v250_v33 = vcombine.high %v240_v28, %v621_v30  ;;  %p525_p4 = pnand %p524_p1, %p518_p0 }
  0x4e   : > { %257 = vst.msk [vmem:[%s177_s18 + $0x10] sm:$0xf] %vm252_vm0, %v240_v28  ;;  %259 = vst.msk [vmem:[%s177_s18 + $0x18] sm:$0xf] %vm252_vm0, %v247_v29  ;;  %v251_v34 = vcombine.high %v247_v29, %v621_v30 }
  0x4f   : > { %254 = vst.msk [vmem:[%s177_s18 + $0x4] sm:$0xf] %vm252_vm0, %v248_v31  ;;  %256 = vst.msk [vmem:[%s177_s18 + $0xc] sm:$0xf] %vm252_vm0, %v249_v32 }
  0x50   : > { %258 = vst.msk [vmem:[%s177_s18 + $0x14] sm:$0xf] %vm252_vm0, %v250_v33  ;;  %260 = vst.msk [vmem:[%s177_s18 + $0x1c] sm:$0xf] %vm252_vm0, %v251_v34 }
  0x51   : > { %528 = shalt.err (!%p525_p4)
}
  0x52   : > { %s529_s28 = scalar_lea.hbm %s784_s2, 512  ;;  %s533_s3 = scalar_lea.hbm %s843_s1, 2048 }
  0x53   : > { %p530_p3 = scmp.ne.s32.totalorder %s784_s2, %s529_s28  ;;  %p534_p2 = scmp.lt.u32.totalorder %s784_s2, %s843_s1 }
  0x54   : > { %p535_p5 = scmp.lt.u32.totalorder %s533_s3, %s529_s28  ;;  %p537_p8 = scmp.lt.u32.totalorder %s529_s28, %s784_s2 }
  0x55   : > { %p531_p6 = pnand %p530_p3, %p850_p9 }
  0x56   : > { %p536_p10 = por %p535_p5, %p534_p2 }
  0x57   : > { %p532_p7 = pneg %p531_p6 }
  0x58   : > { %p538_p12 = por %p537_p8, %p536_p10 }
  0x5a   : > { %p539_p0 = pnand %p538_p12, %p532_p7 }
  0x5c   : > { %542 = shalt.err (!%p539_p0)
}
  0x5d   : > { %s623_s18 = smov 64   ;;  %s624_s9 = smov 4  }
  0x5e   : > { %397 = dma.vmem_to_hbm [thread:$0]  (%p850_p9), %s776_s19, 512, %s784_s2, %s262_s4, %s623_s18, %s623_s18, %s624_s9  }
  0x5f PF: > { %p408_p11 = scmp.ge.s32.totalorder %s613_s13, 2  ;;  %s294_s10 = sand.u32 1, %s585_s6  }
  0x60   : > { %p851_p13 = scmp.ne.s32.totalorder %s848_s25, 0  ;;  %s295_s26 = scalar_lea.sflag [#allocation4], %s294_s10 }
  0x62   : > { %p404_p1 = pnand %p408_p11, %p851_p13 }
  0x64   : > { %580 = dma.done.wait (!%p404_p1), %s295_s26, 512  }
  0x65   : > { %582 = vsyncadd (!%p404_p1), %s295_s26, 4294966784  ;;  %s17_s13 = sadd.s32 1, %s613_s13   ;;  %s852_s6 = smov %s589_s7 }
  0x66   : > { %p14_p4 = scmp.ge.s32.totalorder %s17_s13, 6   ;;  %s853_s7 = smov %s593_s8 }
  0x67   : > { %s854_s8 = smov %s713_s27  ;;  %s855_s9 = smov %s605_s11 }
  0x68   : > { %s856_s10 = smov %s609_s12  ;;  %s857_s11 = smov %s860_s16 }
  0x69   : > { %s858_s12 = smov %s864_s17  ;;  %16 = sbr.rel (!%p14_p4) target bundleno = 7 (0x7), region = 69 }
  0x70   :  { %300 = vsyncpa [#allocation3], 1 }
  0x71   :  { %302 = vsyncpa [#allocation3 + $0x1], 1 }
  0x72   :  { %303 = vsyncpa [#allocation4], 1 }
  0x73   :  { %305 = vsyncpa [#allocation4 + $0x1], 1 }

// kernel: tpu_custom_call.1
= control target key start
LH: loop header
LB: loop body
LE: loop exit
PB: predicated region body
PF: predicated region fallthrough
CT: control target
= control target key end

     0   :  { %6 = vsyncpa [#allocation3], 0  ;;  %s968_s0 = inlined_call_operand.hbm [shape: f32[2,4,16,16], index: 0, kind: input, shape index: {}]   ;;  %s969_s1 = inlined_call_operand.hbm [shape: f32[2,16,4,16], index: 1, kind: output, shape index: {}]  }
   0x1   :  { %8 = vsyncpa [#allocation3 + $0x1], 0 }
   0x2   :  { %9 = vsyncpa [#allocation4], 0 }
   0x3   :  { %11 = vsyncpa [#allocation4 + $0x1], 0  ;;  %s690_s6 = smov 0   ;;  %s692_s7 = smov 0  }
   0x4   :  { %s694_s8 = smov 0   ;;  %s696_s9 = smov 0  }
   0x5   :  { %s698_s10 = smov 0   ;;  %s700_s11 = smov 0  }
   0x6   :  { %s702_s12 = smov 0   ;;  %s704_s13 = smov 0  }
   0x7 LB: > { %s437_s14 = sadd.s32 4294967295, %s671_s13   ;;  %s438_s15 = sadd.s32 4294967294, %s671_s13   ;;  %s671_s13 = sphi %s704_s13, %s17_s13   ;;  %s667_s12 = sphi %s702_s12, %s984_s12   ;;  %s663_s11 = sphi %s700_s11, %s983_s11   ;;  %s659_s10 = sphi %s698_s10, %s982_s10   ;;  %s655_s9 = sphi %s696_s9, %s981_s9   ;;  %s651_s8 = sphi %s694_s8, %s980_s8   ;;  %s647_s7 = sphi %s692_s7, %s979_s7   ;;  %s643_s6 = sphi %s690_s6, %s978_s6  }
   0x8   : > { %s35_s16 = sadd.s32 1, %s663_s11  ;;  %s43_s17 = sadd.s32 1, %s667_s12 }
   0x9   : > { %p37_p0 = scmp.ge.s32.totalorder %s35_s16, 2  ;;  %s56_s18 = sadd.s32 1, %s651_s8 }
   0xa   : > { %p63_p1 = scmp.ne.s32.totalorder %s651_s8, %s647_s7  ;;  %p64_p2 = scmp.eq.s32.totalorder %s671_s13, 0 }
   0xb   : > { %s986_s16 = smov (%p37_p0, %s35_s16), 0  ;;  %s988_s17 = smov (!%p37_p0, %s43_s17), %s667_s12 }
   0xc   : > { %s50_s19 = ssub.s32 %s663_s11, %s986_s16  ;;  %p743_p3 = por %p64_p2, %p63_p1 }
   0xd   : > { %p45_p4 = scmp.ge.s32.totalorder %s988_s17, 2  ;;  %p69_p5 = scmp.ne.s32.totalorder %s647_s7, %s643_s6 }
   0xe   : > { %p70_p6 = scmp.eq.s32.totalorder %s437_s14, 0  ;;  %p99_p7 = scmp.eq.s32.totalorder %s437_s14, 3 }
   0xf   : > { %s990_s17 = smov (%p45_p4, %s988_s17), 0  ;;  %p105_p10 = scmp.eq.s32.totalorder %s438_s15, 3 }
  0x10   : > { %p751_p8 = por %p70_p6, %p69_p5  ;;  %p755_p9 = por %p99_p7, %p63_p1 }
  0x11   : > { %s47_s23 = ssub.s32 %s667_s12, %s990_s17  ;;  %p761_p12 = por %p105_p10, %p69_p5 }
  0x12   : > { %s973_s22 = scalar_select %p755_p9, 1, 0 }
  0x13   : > { %s51_s24 = sor.u32 %s50_s19, %s47_s23  ;;  %p472_p13 = scmp.lt.s32.totalorder %s671_s13, 4 }
  0x14   : > { %p54_p11 = scmp.eq.s32.totalorder %s51_s24, 0  ;;  %s125_s26 = sand.u32 1, %s651_s8  }
  0x15   : > { %s974_s25 = scalar_select %p761_p12, 1, 0 }
  0x16   : > { %s768_s27 = scalar_select %p54_p11, %s651_s8, %s56_s18  }
  0x17   : > { %s441_s28 = sshll.u32 %s125_s26, 5  ;;  %s442_s29 = sshll.u32 %s667_s12, 3 }
  0x18   : > { %s138_s30 = sadd.s32 %s663_s11, %s442_s29  ;;  %s129_s2 = scalar_lea.vmem [#allocation2], %s441_s28 }
  0x19   : > { %s141_s3 = sshll.u32 %s129_s2, 4  ;;  %s443_s4 = sshll.u32 %s138_s30, 7  ;;  %s772_s3 = int_to_ptr.vmem [resolvable:$true] %s141_s3 }
  0x1a   : > { %s777_s15 = scalar_lea.hbm %s968_s0, %s443_s4  ;;  %p781_p0 = pnand %p472_p13, %p743_p3 }
  0x1b   : > { %s785_s19 = scalar_lea.sflag [#allocation3], %s125_s26  ;;  %s543_s23 = scalar_lea.hbm %s777_s15, 512 }
  0x1c   : > { %p544_p1 = scmp.ne.s32.totalorder %s777_s15, %s543_s23  ;;  %p545_p2 = pneg %p781_p0 }
  0x1d   : > { %s548_s28 = scalar_lea.hbm %s968_s0, 2048  ;;  %p549_p3 = scmp.lt.u32.totalorder %s777_s15, %s968_s0 }
  0x1e   : > { %p546_p4 = pnand %p545_p2, %p544_p1  ;;  %p550_p6 = scmp.lt.u32.totalorder %s548_s28, %s543_s23 }
  0x1f   : > { %p552_p10 = scmp.lt.u32.totalorder %s543_s23, %s777_s15 }
  0x20   : > { %p547_p5 = pneg %p546_p4  ;;  %p551_p7 = por %p550_p6, %p549_p3 }
  0x22   : > { %p553_p11 = por %p552_p10, %p551_p7 }
  0x24   : > { %p554_p13 = pnand %p553_p11, %p547_p5 }
  0x26   : > { %557 = shalt.err (!%p554_p13)
}
  0x27   : > { %s558_s26 = scalar_lea.vmem %s772_s3, 512  ;;  %s673_s2 = smov [#allocation2]  }
  0x28   : > { %p559_p1 = scmp.ne.s32.totalorder %s772_s3, %s558_s26  ;;  %s563_s4 = sshll.u32 %s673_s2, 4  ;;  %s564_s4 = int_to_ptr.vmem [resolvable:$false] %s563_s4 }
  0x29   : > { %s565_s5 = scalar_lea.vmem %s564_s4, 1024  ;;  %p566_p9 = scmp.lt.s32.totalorder %s772_s3, %s564_s4 }
  0x2a   : > { %p561_p4 = pnand %p559_p1, %p545_p2  ;;  %p567_p3 = scmp.lt.s32.totalorder %s565_s5, %s558_s26 }
  0x2c   : > { %p562_p12 = pneg %p561_p4  ;;  %p568_p6 = por %p567_p3, %p566_p9 }
  0x2e   : > { %p569_p7 = pnand %p568_p6, %p562_p12 }
  0x30   : > { %572 = shalt.err (!%p569_p7)
}
  0x31   : > { %s674_s14 = smov 256   ;;  %s675_s23 = smov 128  }
  0x32   : > { %s676_s20 = smov 8   ;;  %p444_p2 = scmp.ge.s32.totalorder %s671_s13, 1 }
  0x33   : > { %467 = dma.hbm_to_vmem [thread:$0]  (!%p781_p0), %s777_s15, 512, %s772_s3, %s785_s19, %s674_s14, %s675_s23, %s676_s20  }
  0x34   : > { %p149_p5 = scmp.lt.s32.totalorder %s671_s13, 5 }
  0x36   : > { %p150_p10 = pnand %p444_p2, %p149_p5 }
  0x37   : > { %s816_s24 = sand.u32 (!%p150_p10), 1, %s647_s7  }
  0x38   : > { %153 = sbr.rel (%p150_p10) target bundleno = 106 (0x6a), region = 24  ;;  %s445_s28 = sshll.u32 (!%p150_p10), %s816_s24, 5 }
  0x39   : > { %s156_s29 = scalar_lea.sflag (!%p150_p10), [#allocation3], %s816_s24  ;;  %s822_s30 = scalar_lea.vmem (!%p150_p10), [#allocation2], %s445_s28 }
  0x3f   : > { %634 = dma.done.wait (%p751_p8), %s156_s29, 512  }
  0x40   : > { %636 = vsyncadd (%p751_p8), %s156_s29, 4294966784  ;;  %vm189_vm0 = vcmask 1041409   ;;  %vm192_vm1 = vcmask 1042434   ;;  %vm195_vm2 = vcmask 1043459   ;;  %v180_v0 = vld [vmem:[%s822_s30] sm:$0x1] }
  0x41   : > { %v181_v1 = vld [vmem:[%s822_s30 + $0x8] sm:$0x1]  ;;  %v182_v2 = vld [vmem:[%s822_s30 + $0x10] sm:$0x1]  ;;  %v183_v3 = vld [vmem:[%s822_s30 + $0x18] sm:$0x1] }
  0x42   : > { %v188_v4 = vrot.slane %v181_v1, 7  ;;  %v191_v5 = vrot.slane %v182_v2, 6  ;;  %v200_v6 = vld [vmem:[%s822_s30 + $0x1] sm:$0x1]  ;;  %v194_v7 = vrot.slane %v183_v3, 5  ;;  %vm198_vm3 = vcmask 125952  }
  0x43   : > { %v201_v8 = vld [vmem:[%s822_s30 + $0x9] sm:$0x1]  ;;  %v202_v9 = vld [vmem:[%s822_s30 + $0x11] sm:$0x1]  ;;  %v203_v11 = vld [vmem:[%s822_s30 + $0x19] sm:$0x1] }
  0x44   : > { %v190_v10 = vsel %vm189_vm0, %v188_v4, %v180_v0  ;;  %v208_v12 = vrot.slane %v201_v8, 7  ;;  %v210_v13 = vrot.slane %v202_v9, 6  ;;  %v217_v14 = vld [vmem:[%s822_s30 + $0x2] sm:$0x1]  ;;  %v212_v16 = vrot.slane %v203_v11, 5  ;;  %s847_s21 = scalar_lea.vmem [#allocation5], %s445_s28 }
  0x45   : > { %v193_v15 = vsel %vm192_vm1, %v191_v5, %v190_v10  ;;  %v218_v17 = vld [vmem:[%s822_s30 + $0xa] sm:$0x1]  ;;  %v219_v18 = vld [vmem:[%s822_s30 + $0x12] sm:$0x1]  ;;  %v220_v21 = vld [vmem:[%s822_s30 + $0x1a] sm:$0x1] }
  0x46   : > { %v196_v19 = vsel %vm195_vm2, %v194_v7, %v193_v15  ;;  %v209_v20 = vsel %vm189_vm0, %v208_v12, %v200_v6  ;;  %v225_v22 = vrot.slane %v218_v17, 7  ;;  %v227_v23 = vrot.slane %v219_v18, 6  ;;  %v234_v24 = vld [vmem:[%s822_s30 + $0x3] sm:$0x1]  ;;  %v235_v27 = vld [vmem:[%s822_s30 + $0xb] sm:$0x1] }
  0x47   : > { %199 = vst.msk [vmem:[%s847_s21] sm:$0xf] %vm198_vm3, %v196_v19  ;;  %v211_v25 = vsel %vm192_vm1, %v210_v13, %v209_v20  ;;  %v229_v26 = vrot.slane %v220_v21, 5  ;;  %v236_v28 = vld [vmem:[%s822_s30 + $0x13] sm:$0x1]  ;;  %s455_s3 = sshll.u32 %s655_s9, 3 }
  0x48   : > { %v213_v29 = vsel %vm195_vm2, %v212_v16, %v211_v25  ;;  %v226_v30 = vsel %vm189_vm0, %v225_v22, %v217_v14  ;;  %v237_v31 = vld [vmem:[%s822_s30 + $0x1b] sm:$0x1]  ;;  %v242_v32 = vrot.slane %v235_v27, 7  ;;  %v244_v33 = vrot.slane %v236_v28, 6  ;;  %v251_v34 = vld [vmem:[%s822_s30 + $0x4] sm:$0x1] }
  0x49   : > { %447 = vst.msk [vmem:[%s847_s21 + $0x4] sm:$0xf] %vm198_vm3, %v213_v29  ;;  %v228_v35 = vsel %vm192_vm1, %v227_v23, %v226_v30  ;;  %v246_v36 = vrot.slane %v237_v31, 5  ;;  %v252_v37 = vld [vmem:[%s822_s30 + $0xc] sm:$0x1]  ;;  %s456_s15 = sshll.u32 %s659_s10, 4 }
  0x4a   : > { %v253_v38 = vld [vmem:[%s822_s30 + $0x14] sm:$0x1]  ;;  %v230_v39 = vsel %vm195_vm2, %v229_v26, %v228_v35  ;;  %v243_v40 = vsel %vm189_vm0, %v242_v32, %v234_v24  ;;  %v254_v41 = vld [vmem:[%s822_s30 + $0x1c] sm:$0x1]  ;;  %v259_v42 = vrot.slane %v252_v37, 7  ;;  %s334_s10 = sadd.s32 %s456_s15, %s455_s3  ;;  %s337_s18 = sshll.u32 %s847_s21, 4  ;;  %s901_s18 = int_to_ptr.vmem [resolvable:$true] %s337_s18 }
  0x4b   : > { %v261_v43 = vrot.slane %v253_v38, 6  ;;  %v268_v44 = vld [vmem:[%s822_s30 + $0x5] sm:$0x1]  ;;  %448 = vst.msk [vmem:[%s847_s21 + $0x8] sm:$0xf] %vm198_vm3, %v230_v39  ;;  %v245_v45 = vsel %vm192_vm1, %v244_v33, %v243_v40  ;;  %v263_v46 = vrot.slane %v254_v41, 5 }
  0x4c   : > { %v269_v47 = vld [vmem:[%s822_s30 + $0xd] sm:$0x1]  ;;  %v270_v48 = vld [vmem:[%s822_s30 + $0x15] sm:$0x1]  ;;  %v247_v49 = vsel %vm195_vm2, %v246_v36, %v245_v45  ;;  %v260_v50 = vsel %vm189_vm0, %v259_v42, %v251_v34  ;;  %v271_v51 = vld [vmem:[%s822_s30 + $0x1d] sm:$0x1] }
  0x4d   : > { %v276_v52 = vrot.slane %v269_v47, 7  ;;  %v278_v53 = vrot.slane %v270_v48, 6  ;;  %v285_v54 = vld [vmem:[%s822_s30 + $0x6] sm:$0x1]  ;;  %449 = vst.msk [vmem:[%s847_s21 + $0xc] sm:$0xf] %vm198_vm3, %v247_v49  ;;  %v262_v55 = vsel %vm192_vm1, %v261_v43, %v260_v50 }
  0x4e   : > { %v280_v56 = vrot.slane %v271_v51, 5  ;;  %v286_v57 = vld [vmem:[%s822_s30 + $0xe] sm:$0x1]  ;;  %v287_v58 = vld [vmem:[%s822_s30 + $0x16] sm:$0x1]  ;;  %v264_v59 = vsel %vm195_vm2, %v263_v46, %v262_v55  ;;  %s457_s9 = sshll.u32 %s334_s10, 6 }
  0x4f   : > { %v277_v60 = vsel %vm189_vm0, %v276_v52, %v268_v44  ;;  %v288_v61 = vld [vmem:[%s822_s30 + $0x1e] sm:$0x1]  ;;  %v293_v62 = vrot.slane %v286_v57, 7  ;;  %v295_v63 = vrot.slane %v287_v58, 6  ;;  %v302_v0 = vld [vmem:[%s822_s30 + $0x7] sm:$0x1]  ;;  %s911_s2 = scalar_lea.hbm %s969_s1, %s457_s9 }
  0x50   : > { %450 = vst.msk [vmem:[%s847_s21 + $0x10] sm:$0xf] %vm198_vm3, %v264_v59  ;;  %v279_v1 = vsel %vm192_vm1, %v278_v53, %v277_v60  ;;  %v297_v2 = vrot.slane %v288_v61, 5  ;;  %v303_v3 = vld [vmem:[%s822_s30 + $0xf] sm:$0x1]  ;;  %s320_s4 = scalar_lea.sflag [#allocation4], %s816_s24 }
  0x51   : > { %v304_v4 = vld [vmem:[%s822_s30 + $0x17] sm:$0x1]  ;;  %v281_v5 = vsel %vm195_vm2, %v280_v56, %v279_v1  ;;  %v294_v6 = vsel %vm189_vm0, %v293_v62, %v285_v54  ;;  %v305_v7 = vld [vmem:[%s822_s30 + $0x1f] sm:$0x1]  ;;  %v310_v8 = vrot.slane %v303_v3, 7  ;;  %s573_s5 = scalar_lea.vmem %s901_s18, 512 }
  0x52   : > { %v312_v9 = vrot.slane %v304_v4, 6  ;;  %451 = vst.msk [vmem:[%s847_s21 + $0x14] sm:$0xf] %vm198_vm3, %v281_v5  ;;  %v296_v10 = vsel %vm192_vm1, %v295_v63, %v294_v6  ;;  %v314_v11 = vrot.slane %v305_v7, 5  ;;  %p574_p8 = scmp.ne.s32.totalorder %s901_s18, %s573_s5  ;;  %p976_p9 = scmp.ne.s32.totalorder %s973_s22, 0 }
  0x53   : > { %v298_v12 = vsel %vm195_vm2, %v297_v2, %v296_v10  ;;  %v311_v13 = vsel %vm189_vm0, %v310_v8, %v302_v0  ;;  %s677_s14 = smov [#allocation5]  }
  0x54   : > { %452 = vst.msk [vmem:[%s847_s21 + $0x18] sm:$0xf] %vm198_vm3, %v298_v12  ;;  %v313_v14 = vsel %vm192_vm1, %v312_v9, %v311_v13  ;;  %p575_p12 = pnand %p574_p8, %p976_p9  ;;  %s577_s23 = sshll.u32 %s677_s14, 4  ;;  %s578_s23 = int_to_ptr.vmem [resolvable:$false] %s577_s23 }
  0x55   : > { %v315_v15 = vsel %vm195_vm2, %v314_v11, %v313_v14  ;;  %s579_s20 = scalar_lea.vmem %s578_s23, 1024  ;;  %p580_p11 = scmp.lt.s32.totalorder %s901_s18, %s578_s23 }
  0x56   : > { %453 = vst.msk [vmem:[%s847_s21 + $0x1c] sm:$0xf] %vm198_vm3, %v315_v15  ;;  %p576_p0 = pneg %p575_p12  ;;  %p581_p13 = scmp.lt.s32.totalorder %s579_s20, %s573_s5 }
  0x58   : > { %p582_p1 = por %p581_p13, %p580_p11 }
  0x5a   : > { %p583_p4 = pnand %p582_p1, %p576_p0 }
  0x5c   : > { %586 = shalt.err (!%p583_p4)
}
  0x5d   : > { %s587_s28 = scalar_lea.hbm %s911_s2, 512  ;;  %s591_s21 = scalar_lea.hbm %s969_s1, 2048 }
  0x5e   : > { %p588_p3 = scmp.ne.s32.totalorder %s911_s2, %s587_s28  ;;  %p592_p2 = scmp.lt.u32.totalorder %s911_s2, %s969_s1 }
  0x5f   : > { %p593_p5 = scmp.lt.u32.totalorder %s591_s21, %s587_s28  ;;  %p595_p8 = scmp.lt.u32.totalorder %s587_s28, %s911_s2 }
  0x60   : > { %p589_p6 = pnand %p588_p3, %p976_p9 }
  0x61   : > { %p594_p10 = por %p593_p5, %p592_p2 }
  0x62   : > { %p590_p7 = pneg %p589_p6 }
  0x63   : > { %p596_p12 = por %p595_p8, %p594_p10 }
  0x65   : > { %p597_p0 = pnand %p596_p12, %p590_p7 }
  0x67   : > { %600 = shalt.err (!%p597_p0)
}
  0x68   : > { %s678_s10 = smov 64   ;;  %s679_s9 = smov 4  }
  0x69   : > { %462 = dma.vmem_to_hbm [thread:$0]  (%p976_p9), %s901_s18, 512, %s911_s2, %s320_s4, %s678_s10, %s678_s10, %s679_s9  }
  0x6a PF: > { %p473_p11 = scmp.ge.s32.totalorder %s671_s13, 2  ;;  %s352_s19 = sand.u32 1, %s643_s6  }
  0x6b   : > { %p977_p13 = scmp.ne.s32.totalorder %s974_s25, 0  ;;  %s353_s26 = scalar_lea.sflag [#allocation4], %s352_s19 }
  0x6d   : > { %p469_p1 = pnand %p473_p11, %p977_p13 }
  0x6f   : > { %638 = dma.done.wait (!%p469_p1), %s353_s26, 512  }
  0x70   : > { %640 = vsyncadd (!%p469_p1), %s353_s26, 4294966784  ;;  %s17_s13 = sadd.s32 1, %s671_s13   ;;  %s978_s6 = smov %s647_s7 }
  0x71   : > { %p14_p4 = scmp.ge.s32.totalorder %s17_s13, 6   ;;  %s979_s7 = smov %s651_s8 }
  0x72   : > { %s980_s8 = smov %s768_s27  ;;  %s981_s9 = smov %s663_s11 }
  0x73   : > { %s982_s10 = smov %s667_s12  ;;  %s983_s11 = smov %s986_s16 }
  0x74   : > { %s984_s12 = smov %s990_s17  ;;  %16 = sbr.rel (!%p14_p4) target bundleno = 7 (0x7), region = 76 }
  0x7b   :  { %358 = vsyncpa [#allocation3], 1 }
  0x7c   :  { %360 = vsyncpa [#allocation3 + $0x1], 1 }
  0x7d   :  { %361 = vsyncpa [#allocation4], 1 }
  0x7e   :  { %363 = vsyncpa [#allocation4 + $0x1], 1 }

</bundles_post_ra>
